<compile_context>
chip_gen: v6e
topology: v6e:2x2x1
jax: 0.10.0
libtpu: 0.0.40
codegen_flags: <defaults>
</compile_context>

<pallas_src>
import functools

import jax
import jax.numpy as jnp
from jax.experimental import pallas as pl
from jax.experimental.pallas import tpu as pltpu


def _round_up(a: int, m: int) -> int:
    return ((a + m - 1) // m) * m


def _clustering_kernel(x_ref, neg2c_ref, c_sq_ref, q_ref):
    x = x_ref[...]                                        # (TILE_N, D) f32

    # ||x||^2 per row.
    x_sq = jnp.sum(x * x, axis=-1, keepdims=True)         # (TILE_N, 1)

    # Cross term on the MXU; the -2 and ||c||^2 were precomputed once in the wrapper
    # (loop-invariant), so the per-step body is just: dot, add, reciprocal, square, norm.
    xc = jax.lax.dot_general(                             # (TILE_N, K)
        x, neg2c_ref[...],
        dimension_numbers=(((1,), (1,)), ((), ())),
        preferred_element_type=jnp.float32,
    )

    dist2 = jnp.maximum(x_sq + c_sq_ref[...] + xc, 0.0)   # clip tiny negative round-off
    q = pl.reciprocal(1.0 + dist2, approx=False)          # Student-t kernel (alpha = 1)
    q = q * q                                             # q ** (2/(2-1)) == q ** 2

    row_sum = jnp.sum(q, axis=1, keepdims=True)           # (TILE_N, 1)
    q_ref[...] = q * pl.reciprocal(row_sum, approx=False)


@functools.partial(jax.jit, static_argnames=("tile_n_max",))
def clustering_layer(x, clusters, *, tile_n_max: int = 4096):
    """x: (N, D) f32, clusters: (K, D) f32 -> q: (N, K) f32."""
    n, d = x.shape
    k, d2 = clusters.shape
    assert d == d2, "embedding dims must match"

    x = x.astype(jnp.float32)
    clusters = clusters.astype(jnp.float32)

    # Hoisted, loop-invariant cluster operands (computed once, fused by XLA under jit).
    neg2c = clusters * (-2.0)                               # (K, D)
    c_sq = jnp.sum(clusters * clusters, axis=-1)[None, :]   # (1, K)

    # --- tile selection -----------------------------------------------------
    # Large tiles amortize per-step pipeline overhead; keep >=4 grid steps when N
    # allows (so both v7x TensorCores get work and double-buffering can overlap),
    # and cap so the double-buffered x/q tiles stay within a modest VMEM budget.
    n8 = _round_up(n, 8)
    per_step = _round_up(-(-n8 // 4), 8)                    # ceil(n8/4) rounded to 8
    bytes_per_row = 4 * (d + k)
    vmem_row_budget = 8 << 20                               # ~8 MiB for streamed tiles
    tile_cap_vmem = max(8, (vmem_row_budget // (2 * bytes_per_row)) // 8 * 8)
    tile_n = max(8, min(tile_n_max, per_step, tile_cap_vmem))
    n_pad = _round_up(n, tile_n)

    x_p = x if n_pad == n else jnp.zeros((n_pad, d), jnp.float32).at[:n].set(x)

    grid = (n_pad // tile_n,)

    # VMEM: double-buffered x & q tiles + single-buffered resident cluster operands.
    vmem_bytes = (2 * tile_n * d * 4 + 2 * tile_n * k * 4
                  + k * d * 4 + k * 4 + (4 << 20))
    vmem_limit = min(max(vmem_bytes, 16 << 20), 32 << 20)

    cost = pl.CostEstimate(
        flops=2 * n_pad * k * d + 6 * n_pad * k,
        transcendentals=0,
        bytes_accessed=4 * (n_pad * d + k * d + k + n_pad * k),
    )

    q_pad = pl.pallas_call(
        _clustering_kernel,
        out_shape=jax.ShapeDtypeStruct((n_pad, k), jnp.float32),
        grid_spec=pltpu.PrefetchScalarGridSpec(
            num_scalar_prefetch=0,
            grid=grid,
            in_specs=[
                # Streamed x tiles: full (unpadded) D as the last block dim.
                pl.BlockSpec((tile_n, d), lambda i: (i, 0)),
                # Resident -2*clusters (constant index_map -> single buffer is enough).
                pl.BlockSpec((k, d), lambda i: (0, 0), pipeline_mode=pl.Buffered(1)),
                # Resident ||c||^2 row vector.
                pl.BlockSpec((1, k), lambda i: (0, 0), pipeline_mode=pl.Buffered(1)),
            ],
            # Unpadded-K output: no 25x write inflation, no post-kernel K slice.
            out_specs=pl.BlockSpec((tile_n, k), lambda i: (i, 0)),
        ),
        compiler_params=pltpu.CompilerParams(
            dimension_semantics=("parallel",),
            vmem_limit_bytes=vmem_limit,
        ),
        cost_estimate=cost,
    )(x_p, neg2c, c_sq)

    return q_pad if n_pad == n else q_pad[:n]


def reference(x, clusters):
    diff = x[:, None, :] - clusters[None, :, :]
    q = 1.0 / (1.0 + jnp.sum(diff * diff, axis=2))
    q = q ** (2.0 / (2.0 - 1.0))
    return q / jnp.sum(q, axis=1, keepdims=True)


if __name__ == "__main__":
    n_clusters = 5
    embedding_dim = 32
    batch = 16

    key = jax.random.PRNGKey(0)
    kx, kc = jax.random.split(key)

    x = jax.random.normal(kx, (batch, embedding_dim), dtype=jnp.float32)

    # Deterministic xavier_normal_ init: std = sqrt(2 / (fan_in + fan_out))
    xavier_std = (2.0 / (n_clusters + embedding_dim)) ** 0.5
    clusters = xavier_std * jax.random.normal(
        kc, (n_clusters, embedding_dim), dtype=jnp.float32
    )

    q = clustering_layer(x, clusters)
    jax.block_until_ready(q)

    q_ref = reference(x, clusters)
    assert q.shape == (batch, n_clusters)
    assert jnp.allclose(q, q_ref, atol=1e-5, rtol=1e-5), (
        f"max abs err {jnp.max(jnp.abs(q - q_ref))}"
    )
    print("KERNEL_OK")
</pallas_src>

<mosaic_0001>
module attributes {stable_mosaic.version = 11 : i64} {
  func.func @_clustering_kernel(%arg0: i32, %arg1: memref<8x32xf32, #tpu.memory_space<vmem>>, %arg2: memref<5x32xf32, #tpu.memory_space<vmem>>, %arg3: memref<1x5xf32, #tpu.memory_space<vmem>>, %arg4: memref<8x5xf32, #tpu.memory_space<vmem>>) attributes {dimension_semantics = [#tpu.dimension_semantics<parallel>], iteration_bounds = array<i64: 2>, scalar_prefetch = 0 : i64, scratch_operands = 0 : i64, tpu.core_type = #tpu.core_type<tc>, window_params = [{transform_indices = @transform_0, window_bounds = array<i64: 8, 32>}, {pipeline_mode = #tpu.pipeline_mode<synchronous>, transform_indices = @transform_1, window_bounds = array<i64: 5, 32>}, {pipeline_mode = #tpu.pipeline_mode<synchronous>, transform_indices = @transform_2, window_bounds = array<i64: 1, 5>}, {transform_indices = @transform_3, window_bounds = array<i64: 8, 5>}]} {
    %c0 = arith.constant 0 : index
    %c0_0 = arith.constant 0 : index
    %0 = vector.load %arg1[%c0, %c0_0] : memref<8x32xf32, #tpu.memory_space<vmem>>, vector<8x32xf32>
    %1 = arith.mulf %0, %0 : vector<8x32xf32>
    %cst = arith.constant dense<0.000000e+00> : vector<8xf32>
    %2 = vector.multi_reduction <add>, %1, %cst [1] : vector<8x32xf32> to vector<8xf32>
    %3 = vector.shape_cast %2 : vector<8xf32> to vector<8x1xf32>
    %c0_1 = arith.constant 0 : index
    %c0_2 = arith.constant 0 : index
    %4 = vector.load %arg2[%c0_1, %c0_2] : memref<5x32xf32, #tpu.memory_space<vmem>>, vector<5x32xf32>
    %cst_3 = arith.constant dense<0.000000e+00> : vector<8x5xf32>
    %5 = tpu.matmul %0, %4, %cst_3 {dimension_numbers = #tpu.dot_dimension_numbers<[1], [1], [0], [0], [0, 0, 1, 0], [], []>} : vector<8x32xf32>, vector<5x32xf32>, vector<8x5xf32> -> vector<8x5xf32>
    %c0_4 = arith.constant 0 : index
    %c0_5 = arith.constant 0 : index
    %6 = vector.load %arg3[%c0_4, %c0_5] : memref<1x5xf32, #tpu.memory_space<vmem>>, vector<1x5xf32>
    %7 = vector.broadcast %3 : vector<8x1xf32> to vector<8x5xf32>
    %8 = vector.broadcast %6 : vector<1x5xf32> to vector<8x5xf32>
    %9 = arith.addf %7, %8 : vector<8x5xf32>
    %10 = arith.addf %9, %5 : vector<8x5xf32>
    %cst_6 = arith.constant 0.000000e+00 : f32
    %11 = vector.broadcast %cst_6 : f32 to vector<8x5xf32>
    %12 = arith.maximumf %10, %11 : vector<8x5xf32>
    %cst_7 = arith.constant 1.000000e+00 : f32
    %13 = vector.broadcast %cst_7 : f32 to vector<8x5xf32>
    %14 = arith.addf %13, %12 : vector<8x5xf32>
    %15 = tpu.reciprocal %14 : vector<8x5xf32> -> vector<8x5xf32>
    %16 = arith.mulf %15, %15 : vector<8x5xf32>
    %cst_8 = arith.constant dense<0.000000e+00> : vector<8xf32>
    %17 = vector.multi_reduction <add>, %16, %cst_8 [1] : vector<8x5xf32> to vector<8xf32>
    %18 = vector.shape_cast %17 : vector<8xf32> to vector<8x1xf32>
    %19 = tpu.reciprocal %18 : vector<8x1xf32> -> vector<8x1xf32>
    %20 = vector.broadcast %19 : vector<8x1xf32> to vector<8x5xf32>
    %21 = arith.mulf %16, %20 : vector<8x5xf32>
    %c0_9 = arith.constant 0 : index
    %c0_10 = arith.constant 0 : index
    %22 = vector.load %arg4[%c0_9, %c0_10] : memref<8x5xf32, #tpu.memory_space<vmem>>, vector<8x5xf32>
    tpu.vector_store %arg4[%c0_9, %c0_10], %21 {strides = array<i32>} : memref<8x5xf32, #tpu.memory_space<vmem>>, vector<8x5xf32>,
    return
  }
  func.func @transform_0(%arg0: i32) -> (i32, i32) {
    %c0_i32 = arith.constant 0 : i32
    %c0_i32_0 = arith.constant 0 : i32
    return %arg0, %c0_i32 : i32, i32
  }
  func.func @transform_1(%arg0: i32) -> (i32, i32) {
    %c0_i32 = arith.constant 0 : i32
    %c0_i32_0 = arith.constant 0 : i32
    %c0_i32_1 = arith.constant 0 : i32
    return %c0_i32, %c0_i32_0 : i32, i32
  }
  func.func @transform_2(%arg0: i32) -> (i32, i32) {
    %c0_i32 = arith.constant 0 : i32
    %c0_i32_0 = arith.constant 0 : i32
    %c0_i32_1 = arith.constant 0 : i32
    return %c0_i32, %c0_i32_0 : i32, i32
  }
  func.func @transform_3(%arg0: i32) -> (i32, i32) {
    %c0_i32 = arith.constant 0 : i32
    %c0_i32_0 = arith.constant 0 : i32
    return %arg0, %c0_i32 : i32, i32
  }
}

</mosaic_0001>

<bundles_post_ra>
// kernel: clustering_layer.1
= control target key start
LH: loop header
LB: loop body
LE: loop exit
PB: predicated region body
PF: predicated region fallthrough
CT: control target
= control target key end

     0   :  { %s385_s12 = smov 0   ;;  %s408_s0 = inlined_call_operand.vmem [shape: f32[16,32], index: 0, kind: input, shape index: {}]   ;;  %s409_s1 = inlined_call_operand.vmem [shape: f32[5,32], index: 1, kind: input, shape index: {}]   ;;  %s410_s2 = inlined_call_operand.vmem [shape: f32[1,5], index: 2, kind: input, shape index: {}]   ;;  %s411_s3 = inlined_call_operand.vmem [shape: f32[16,5], index: 3, kind: output, shape index: {}]  }
   0x1 LB: > { %s322_s13 = sadd.s32 4294967295, %s361_s12   ;;  %p326_p0 = scmp.ge.s32.totalorder %s361_s12, 1  ;;  %s361_s12 = sphi %s385_s12, %s13_s12  }
   0x2   : > { %p136_p1 = scmp.lt.s32.totalorder %s361_s12, 3 }
   0x4   : > { %p137_p2 = pnand %p326_p0, %p136_p1 }
   0x5   : > { %p158_p3 = scmp.lt.s32.totalorder (!%p137_p2), %s322_s13, 1 }
   0x6   : > { %140 = sbr.rel (%p137_p2) target bundleno = 387 (0x183), region = 32 }
   0xb   : > { %vm168_vm0 = vcmask 261120   ;;  %v172_v0 = vld [vmem:[%s409_s1] sm:$0x1f]  ;;  %v363_v1 = vmov 0.0   ;;  %vm364_vm1 = vmmov 0   ;;  %s413_s13 = smov (!%p158_p3, %s322_s13), 1 }
   0xc   : > { %336 = vmatprep.subr.mxu0 %v363_v1  ;;  %338 = vmatprep.mubr.msk.f32.mxu0 %vm364_vm1, %v363_v1  ;;  %s327_s16 = sshll.u32 %s413_s13, 3  ;;  %v331_v5 = vld [vmem:[%s410_s2] ss:$0 sm:$0xff]  ;;  %vm262_vm2 = vcmask 39936  }
   0xd   : > { %337 = vmatpush3.xpose.msk.msra.mxu0 %vm168_vm0, %v172_v0  ;;  %s161_s19 = scalar_lea.vmem %s408_s0, %s327_s16  ;;  %s165_s24 = scalar_lea.vmem %s411_s3, %s327_s16 }
   0xe   : > { %v166_v2 = vld [vmem:[%s161_s19] sm:$0xff] }
   0xf   : > { %v167_v3 = vmul.f32 %v166_v2, %v166_v2 }
  0x10   : > { %339 = vmatmul.mubr.msk.f32.vlgmr.msra.gmra.mxu0 %vm168_vm0, %v166_v2 }
  0x11   : > { %v169_v4 = vsel %vm168_vm0, %v167_v3, 0.0 }
  0x12   : > { %170 = vadd.xlane.f32.xlu0 %v169_v4 }
  0x9b   : > { %v171_v6 = vpop.xlane.xlu0 %170 }
  0x9c   : > { %v256_v7 = vadd.f32 %v331_v5, %v171_v6 }
  0xd0   : > { %v245_v8 = vpop.f32.mrf.mxu0 }
  0xd1   : > { %v257_v9 = vadd.f32 %v256_v7, %v245_v8 }
  0xd2   : > { %v340_v10 = vpop.f32.mrf.mxu0 }
  0xd3   : > { %v258_v11 = vmax.f32 %v257_v9, 0.0 }
  0xd5   : > { %v259_v12 = vadd.f32 1.0, %v258_v11 }
  0xd7   : > { %351 = vrcp.f32 %v259_v12 }
  0xe4   : > { %v352_v13 = vpop.eup %351 }
  0xe5   : > { %v261_v14 = vmul.f32 %v352_v13, %v352_v13 }
  0xe7   : > { %v263_v15 = vsel %vm262_vm2, %v261_v14, 0.0 }
  0xe8   : > { %264 = vadd.xlane.f32.xlu0 %v263_v15 }
 0x171   : > { %v265_v16 = vpop.xlane.xlu0 %264 }
 0x172   : > { %353 = vrcp.f32 %v265_v16 }
 0x17f   : > { %v354_v17 = vpop.eup %353 }
 0x180   : > { %v267_v18 = vmul.f32 %v354_v17, %v261_v14 }
 0x182   : > { %268 = vst.msk [vmem:[%s165_s24] sm:$0xff] %vm262_vm2, %v267_v18 }
 0x183 PF: > { %s13_s12 = sadd.s32 1, %s361_s12  }
 0x184   : > { %p10_p4 = scmp.ge.s32.totalorder %s13_s12, 4  }
 0x186   :  { %12 = sbr.rel (!%p10_p4) target bundleno = 1 (0x1), region = 62 }

</bundles_post_ra>
